<compile_context>
chip_gen: v7x
topology: tpu7x:2x2x1
jax: 0.10.0
libtpu: 0.0.40
codegen_flags: <defaults>
</compile_context>

<pallas_src>
import jax
import jax.numpy as jnp
from jax.experimental import pallas as pl
from jax.experimental.pallas import tpu as pltpu

# ---------------------------------------------------------------------------
# Model dims and packed-parameter slab layout.
# ---------------------------------------------------------------------------
IN_F, H1, H2, OUT_F = 3, 10, 30, 1

# Hidden widths padded to sublane multiples; the row right after the real
# features carries a constant 1.0 through ReLU so layer-2/3 biases fold into
# the matmuls.
A1 = 16                    # padded h1 width: 10 real + ones-carrier + zeros
A2 = 32                    # padded h2 width: 30 real + ones-carrier + zero
ONES1 = H1                 # h1 row that is identically 1.0
ONES2 = H2                 # h2 row that is identically 1.0

R1, R2, R3 = 0, A1, A1 + A2     # row offsets of the three weight blocks (0, 16, 48)
SLAB_ROWS = 56                   # 49 rounded up to a multiple of 8
SLAB_COLS = 128                  # lane-aligned
BIAS_COL = SLAB_COLS - 1         # layer-1 bias column (the only remaining VALU bias add)


def pack_params(params):
    """Pack PyTorch-layout weights/biases into a single (56, 128) f32 slab."""
    slab = jnp.zeros((SLAB_ROWS, SLAB_COLS), jnp.float32)
    # Layer 1: W1 in cols 0..2; bias (plus the ones-carrier) in the last column.
    slab = slab.at[R1:R1 + H1, 0:IN_F].set(params["w1"])
    slab = slab.at[R1:R1 + H1, BIAS_COL].set(params["b1"])
    slab = slab.at[R1 + ONES1, BIAS_COL].set(1.0)          # h1[ONES1] == 1 after ReLU
    # Layer 2: [W2 | b2] with a pass-through row for the ones-carrier.
    slab = slab.at[R2:R2 + H2, 0:H1].set(params["w2"])
    slab = slab.at[R2:R2 + H2, ONES1].set(params["b2"])    # b2 * h1[ONES1] == b2
    slab = slab.at[R2 + ONES2, ONES1].set(1.0)             # h2[ONES2] == 1 after ReLU
    # Layer 3: [W3 | b3].
    slab = slab.at[R3, 0:H2].set(params["w3"][0])
    slab = slab.at[R3, ONES2].set(params["b3"][0])         # b3 * h2[ONES2] == b3
    return slab


def _make_kernel(chunk, n_chunks, compute_dtype):
    def kernel(p_ref, x_ref, o_ref):
        # Parameter loads hoisted out of the chunk loop; they live in vregs for
        # the whole batch tile.
        w1 = p_ref[R1:R1 + A1, 0:IN_F].astype(compute_dtype)        # (16, 3)
        w2 = p_ref[R2:R2 + A2, 0:A1].astype(compute_dtype)          # (32, 16)
        w3 = p_ref[R3:R3 + OUT_F, 0:A2].astype(compute_dtype)       # (1, 32)
        b1 = p_ref[R1:R1 + A1, BIAS_COL:BIAS_COL + 1]               # (16, 1) f32
        # Hoisted lane-broadcast (broadcast_in_dim is not CSE'd inside loops).
        b1f = jnp.broadcast_to(b1, (A1, chunk))

        # Walk the big DMA tile in lane sub-chunks so intermediates stay in
        # vregs (no spills) while the BlockSpec tile stays large.
        @pl.loop(0, n_chunks)
        def _(c):
            start = pl.multiple_of(c * chunk, 128)
            xc = x_ref[:, pl.ds(start, chunk)].astype(compute_dtype)     # (3, chunk)
            h1 = jnp.dot(w1, xc, preferred_element_type=jnp.float32) + b1f
            h1 = jnp.maximum(h1, 0.0)                                    # (16, chunk), row ONES1 == 1
            h2 = jnp.dot(w2, h1.astype(compute_dtype),
                         preferred_element_type=jnp.float32)             # b2 folded into the matmul
            h2 = jnp.maximum(h2, 0.0)                                    # (32, chunk), row ONES2 == 1
            o_ref[:, pl.ds(start, chunk)] = jnp.dot(
                w3, h2.astype(compute_dtype),
                preferred_element_type=jnp.float32).astype(o_ref.dtype)  # b3 folded into the matmul
    return kernel


def iris_reg_forward_fm(x_fm, packed_params, *, btile=65536, chunk=512,
                        compute_dtype=jnp.float32):
    """Performant path: x_fm is feature-major (3, B) float32. Returns (1, B)."""
    assert x_fm.shape[0] == IN_F
    B = x_fm.shape[1]

    # Lane-aligned batch tile; small batches collapse to a single tile.
    btile = max(128, min(btile, pl.cdiv(B, 128) * 128))
    chunk = min(chunk, btile)
    btile = pl.cdiv(btile, chunk) * chunk          # tile is a multiple of the inner chunk
    b_pad = pl.cdiv(B, btile) * btile
    n_chunks = btile // chunk

    x_pad = jnp.pad(x_fm.astype(jnp.float32), ((0, 0), (0, b_pad - B)))

    # VMEM footprint: double-buffered x (3 -> 8 sublane-padded) + out (1 -> 8)
    # + double-buffered param slab.  Only raise the scoped limit if a caller
    # asks for a tile past the smallest default (v5e, 16 MiB).
    vmem_need = 2 * (8 * btile * 4) + 2 * (8 * btile * 4) + 2 * SLAB_ROWS * SLAB_COLS * 4
    vmem_limit = vmem_need + (4 << 20) if vmem_need > (14 << 20) else None

    out = pl.pallas_call(
        _make_kernel(chunk, n_chunks, compute_dtype),
        out_shape=jax.ShapeDtypeStruct((1, b_pad), jnp.float32),
        grid_spec=pltpu.PrefetchScalarGridSpec(
            num_scalar_prefetch=0,
            grid=(b_pad // btile,),
            in_specs=[
                # Packed weights/biases: constant index_map -> stays resident
                # (re-DMA skipped across grid steps).
                pl.BlockSpec((SLAB_ROWS, SLAB_COLS), lambda i: (0, 0)),
                # Streaming feature-major batch tiles (3, btile).
                pl.BlockSpec((IN_F, btile), lambda i: (0, i)),
            ],
            out_specs=pl.BlockSpec((1, btile), lambda i: (0, i)),
        ),
        compiler_params=pltpu.CompilerParams(
            dimension_semantics=("parallel",),   # v7x: shard batch tiles over 2 TCs
            vmem_limit_bytes=vmem_limit,
        ),
    )(packed_params, x_pad)

    # Padded columns hold ReLU(b1)->...->b3 garbage; slice them off.
    return out[:, :B]


def iris_reg_forward(x, packed_params, *, btile=65536, chunk=512,
                     compute_dtype=jnp.float32):
    """PyTorch-facing path: x is (B, 3) float32. Returns (B, 1).

    The transpose here is wrapper-side HBM traffic; feed feature-major data to
    iris_reg_forward_fm directly in production to avoid it.
    """
    out = iris_reg_forward_fm(x.T, packed_params, btile=btile, chunk=chunk,
                              compute_dtype=compute_dtype)
    return out.T


def init_params(key):
    """Deterministic synthetic parameters matching nn.Linear shapes (out, in)."""
    ks = jax.random.split(key, 6)

    def linear(kw, kb, in_f, out_f):
        bound = 1.0 / (in_f ** 0.5)
        w = jax.random.uniform(kw, (out_f, in_f), jnp.float32, -bound, bound)
        b = jax.random.uniform(kb, (out_f,), jnp.float32, -bound, bound)
        return w, b

    w1, b1 = linear(ks[0], ks[1], IN_F, H1)
    w2, b2 = linear(ks[2], ks[3], H1, H2)
    w3, b3 = linear(ks[4], ks[5], H2, OUT_F)
    return {"w1": w1, "b1": b1, "w2": w2, "b2": b2, "w3": w3, "b3": b3}


def reference_forward(x, p):
    y = jnp.maximum(x @ p["w1"].T + p["b1"], 0.0)
    y = jnp.maximum(y @ p["w2"].T + p["b2"], 0.0)
    return y @ p["w3"].T + p["b3"]


if __name__ == "__main__":
    key = jax.random.PRNGKey(0)
    k_param, k_x, k_x2 = jax.random.split(key, 3)

    params = init_params(k_param)
    packed = pack_params(params)

    # Small PyTorch-facing check (single tile, single chunk).
    batch = 8
    x = jax.random.normal(k_x, (batch, IN_F), jnp.float32)
    out = jax.block_until_ready(iris_reg_forward(x, packed))
    ref = reference_forward(x, params)
    assert out.shape == (batch, 1)
    assert jnp.allclose(out, ref, atol=1e-4, rtol=1e-4)

    # Exercise padding, the in-kernel chunk loop, and a multi-step grid.
    batch2 = 1000
    x2 = jax.random.normal(k_x2, (batch2, IN_F), jnp.float32)
    out2 = jax.block_until_ready(iris_reg_forward(x2, packed, btile=512))
    ref2 = reference_forward(x2, params)
    assert out2.shape == (batch2, 1)
    assert jnp.allclose(out2, ref2, atol=1e-4, rtol=1e-4)

    print("KERNEL_OK")
</pallas_src>

<mosaic_0001>
module attributes {stable_mosaic.version = 11 : i64} {
  func.func @kernel(%arg0: i32, %arg1: memref<56x128xf32, #tpu.memory_space<vmem>>, %arg2: memref<3x128xf32, #tpu.memory_space<vmem>>, %arg3: memref<1x128xf32, #tpu.memory_space<vmem>>) attributes {dimension_semantics = [#tpu.dimension_semantics<parallel>], iteration_bounds = array<i64: 1>, scalar_prefetch = 0 : i64, scratch_operands = 0 : i64, tpu.core_type = #tpu.core_type<tc>, window_params = [{pipeline_mode = #tpu.pipeline_mode<synchronous>, transform_indices = @transform_0, window_bounds = array<i64: 56, 128>}, {transform_indices = @transform_1, window_bounds = array<i64: 3, 128>}, {transform_indices = @transform_2, window_bounds = array<i64: 1, 128>}]} {
    %c0 = arith.constant 0 : index
    %c0_0 = arith.constant 0 : index
    %0 = vector.load %arg1[%c0, %c0_0] : memref<56x128xf32, #tpu.memory_space<vmem>>, vector<16x3xf32>
    %c16 = arith.constant 16 : index
    %c0_1 = arith.constant 0 : index
    %1 = vector.load %arg1[%c16, %c0_1] : memref<56x128xf32, #tpu.memory_space<vmem>>, vector<32x16xf32>
    %c48 = arith.constant 48 : index
    %c0_2 = arith.constant 0 : index
    %2 = vector.load %arg1[%c48, %c0_2] : memref<56x128xf32, #tpu.memory_space<vmem>>, vector<1x32xf32>
    %c0_3 = arith.constant 0 : index
    %c127 = arith.constant 127 : index
    %3 = vector.load %arg1[%c0_3, %c127] : memref<56x128xf32, #tpu.memory_space<vmem>>, vector<16x1xf32>
    %4 = vector.shape_cast %3 : vector<16x1xf32> to vector<16x1xf32>
    %5 = vector.broadcast %4 : vector<16x1xf32> to vector<16x128xf32>
    %c0_i32 = arith.constant 0 : i32
    %c1_i32 = arith.constant 1 : i32
    %6 = arith.muli %c0_i32, %c1_i32 : i32
    %c0_i32_4 = arith.constant 0 : i32
    %7 = arith.addi %c0_i32_4, %6 : i32
    %c128_i32 = arith.constant 128 : i32
    %8 = arith.muli %7, %c128_i32 : i32
    %9 = tpu.assume_multiple %8, 128 : i32
    %c0_5 = arith.constant 0 : index
    %10 = arith.index_cast %9 : i32 to index
    %11 = vector.load %arg2[%c0_5, %10] : memref<3x128xf32, #tpu.memory_space<vmem>>, vector<3x128xf32>
    %cst = arith.constant dense<0.000000e+00> : vector<16x128xf32>
    %12 = tpu.matmul %0, %11, %cst {dimension_numbers = #tpu.dot_dimension_numbers<[1], [0], [0], [1], [0, 0, 1, 1], [], []>} : vector<16x3xf32>, vector<3x128xf32>, vector<16x128xf32> -> vector<16x128xf32>
    %13 = arith.addf %12, %5 : vector<16x128xf32>
    %cst_6 = arith.constant 0.000000e+00 : f32
    %14 = vector.broadcast %cst_6 : f32 to vector<16x128xf32>
    %15 = arith.maximumf %13, %14 : vector<16x128xf32>
    %cst_7 = arith.constant dense<0.000000e+00> : vector<32x128xf32>
    %16 = tpu.matmul %1, %15, %cst_7 {dimension_numbers = #tpu.dot_dimension_numbers<[1], [0], [0], [1], [0, 0, 1, 1], [], []>} : vector<32x16xf32>, vector<16x128xf32>, vector<32x128xf32> -> vector<32x128xf32>
    %cst_8 = arith.constant 0.000000e+00 : f32
    %17 = vector.broadcast %cst_8 : f32 to vector<32x128xf32>
    %18 = arith.maximumf %16, %17 : vector<32x128xf32>
    %cst_9 = arith.constant dense<0.000000e+00> : vector<1x128xf32>
    %19 = tpu.matmul %2, %18, %cst_9 {dimension_numbers = #tpu.dot_dimension_numbers<[1], [0], [0], [1], [0, 0, 1, 1], [], []>} : vector<1x32xf32>, vector<32x128xf32>, vector<1x128xf32> -> vector<1x128xf32>
    %c0_10 = arith.constant 0 : index
    %20 = arith.index_cast %9 : i32 to index
    %21 = vector.load %arg3[%c0_10, %20] : memref<1x128xf32, #tpu.memory_space<vmem>>, vector<1x128xf32>
    tpu.vector_store %arg3[%c0_10, %20], %19 {strides = array<i32>} : memref<1x128xf32, #tpu.memory_space<vmem>>, vector<1x128xf32>,
    %c1_i32_11 = arith.constant 1 : i32
    return
  }
  func.func @transform_0(%arg0: i32) -> (i32, i32) {
    %c0_i32 = arith.constant 0 : i32
    %c0_i32_0 = arith.constant 0 : i32
    %c0_i32_1 = arith.constant 0 : i32
    return %c0_i32, %c0_i32_0 : i32, i32
  }
  func.func @transform_1(%arg0: i32) -> (i32, i32) {
    %c0_i32 = arith.constant 0 : i32
    %c0_i32_0 = arith.constant 0 : i32
    return %c0_i32, %arg0 : i32, i32
  }
  func.func @transform_2(%arg0: i32) -> (i32, i32) {
    %c0_i32 = arith.constant 0 : i32
    %c0_i32_0 = arith.constant 0 : i32
    return %c0_i32, %arg0 : i32, i32
  }
}

</mosaic_0001>

<bundles_post_ra>
// kernel: tpu_custom_call.1
= control target key start
LH: loop header
LB: loop body
LE: loop exit
PB: predicated region body
PF: predicated region fallthrough
CT: control target
= control target key end

     0   :  { %7 = vsyncpa [#allocation3], 0  ;;  %s539_s0 = inlined_call_operand.hbm [shape: f32[56,128], index: 0, kind: input, shape index: {}]   ;;  %s540_s1 = inlined_call_operand.hbm [shape: f32[3,128], index: 1, kind: input, shape index: {}]   ;;  %s541_s2 = inlined_call_operand.hbm [shape: f32[1,128], index: 2, kind: output, shape index: {}]  }
   0x1   :  { %8 = vsyncpa [#allocation6], 0 }
   0x2   :  { %9 = vsyncpa [#allocation4], 0  ;;  %s475_s9 = smov [#allocation2]   ;;  %s403_s13 = scalar_lea.hbm %s539_s0, 896 }
   0x3   :  { %s15_s10 = sshll.u32 %s475_s9, 4  ;;  %p404_p0 = scmp.ne.s32.totalorder %s539_s0, %s403_s13  ;;  %s16_s10 = int_to_ptr.vmem [resolvable:$true] %s15_s10 }
   0x4   :  { %p407_p1 = scmp.lt.u32.totalorder %s403_s13, %s539_s0 }
   0x6   :  { %p409_p2 = pnand %p407_p1, %p404_p0 }
   0x8   :  { %412 = shalt.err (!%p409_p2)
}
   0x9   :  { %s413_s18 = scalar_lea.vmem %s16_s10, 896  ;;  %p418_p4 = scmp.lt.s32.totalorder %s16_s10, %s16_s10 }
   0xa   :  { %p414_p3 = scmp.ne.s32.totalorder %s16_s10, %s413_s18  ;;  %p419_p5 = scmp.lt.s32.totalorder %s413_s18, %s413_s18 }
   0xc   :  { %p420_p6 = por %p419_p5, %p418_p4 }
   0xe   :  { %p421_p7 = pnand %p420_p6, %p414_p3 }
  0x10   :  { %424 = shalt.err (!%p421_p7)
}
  0x11   :  { %s476_s19 = smov 128   ;;  %s477_s20 = smov 8  }
  0x12   :  { %21 = dma.hbm_to_vmem [thread:$0]  %s539_s0, 896, %s16_s10, [#allocation3], %s476_s19, %s476_s19, %s477_s20  }
  0x13   :  { %s478_s23 = smov [#allocation5]   ;;  %s425_s27 = scalar_lea.hbm %s540_s1, 64 }
  0x14   :  { %s28_s24 = sshll.u32 %s478_s23, 4  ;;  %p426_p8 = scmp.ne.s32.totalorder %s540_s1, %s425_s27  ;;  %s29_s24 = int_to_ptr.vmem [resolvable:$true] %s28_s24 }
  0x15   :  { %p429_p9 = scmp.lt.u32.totalorder %s425_s27, %s540_s1 }
  0x17   :  { %p431_p10 = pnand %p429_p9, %p426_p8 }
  0x19   :  { %434 = shalt.err (!%p431_p10)
}
  0x1a   :  { %s435_s4 = scalar_lea.vmem %s29_s24, 64  ;;  %p440_p12 = scmp.lt.s32.totalorder %s29_s24, %s29_s24 }
  0x1b   :  { %p436_p11 = scmp.ne.s32.totalorder %s29_s24, %s435_s4  ;;  %p441_p13 = scmp.lt.s32.totalorder %s435_s4, %s435_s4 }
  0x1d   :  { %p442_p0 = por %p441_p13, %p440_p12 }
  0x1f   :  { %p443_p1 = pnand %p442_p0, %p436_p11 }
  0x21   :  { %446 = shalt.err (!%p443_p1)
}
  0x22   :  { %31 = dma.hbm_to_vmem [thread:$0]  %s540_s1, 64, %s29_s24, [#allocation6]  }
  0x23   :  { %469 = dma.done.wait [#allocation3], 896  }
  0x24   :  { %470 = vsyncadd [#allocation3], 4294966400 }
  0x25   :  { %471 = dma.done.wait [#allocation6], 64  }
  0x26   :  { %472 = vsyncadd [#allocation6], 4294967232  ;;  %v479_v0 = vmov 127   ;;  %vm61_vm0 = vcmask 1042432   ;;  %vm56_vm1 = vcmask 23552   ;;  %v38_v2 = vld [vmem:[#allocation2] sm:$0xff] }
  0x27   :  { %402 = vset.pattern.permute.xlu0 %v479_v0  ;;  %v55_v1 = vld [vmem:[#allocation5] sm:$0x7]  ;;  %v39_v3 = vld [vmem:[#allocation2 + $0x8] sm:$0xff]  ;;  %359 = vmatprep.mubr.msk.f32.mxu0 %vm56_vm1, %v38_v2  ;;  %v40_v4 = vld [vmem:[#allocation2 + $0x10] sm:$0xff]  ;;  %vm142_vm2 = vcmask 130048   ;;  %v480_v17 = vmov 0.0|0.0  }
  0x28   :  { %357 = vmatprep.subr.msk.mxu0 %vm61_vm0, %v55_v1  ;;  %47 = vperm.xlu0 %402, %v38_v2   ;;  %v41_v14 = vld [vmem:[#allocation2 + $0x18] sm:$0xff]  ;;  %v42_v15 = vld [vmem:[#allocation2 + $0x20] sm:$0xff]  ;;  %v43_v16 = vld [vmem:[#allocation2 + $0x28] sm:$0xff]  ;;  %vm481_vm3 = vmmov 0   ;;  %v482_v18 = vmov 0.0   ;;  %vm244_vm4 = vcmask 261120  }
  0x29   :  { %358 = vmatpush3.msk.msra.mxu0 %vm61_vm0, %v55_v1  ;;  %366 = vmatprep.mubr.msk.f32.mxu1 %vm142_vm2, %v40_v4  ;;  %v44_v29 = vld [vmem:[#allocation2 + $0x30] sm:$0x1]  ;;  %s483_s1 = smov [#allocation7]  }
  0x2a   :  { %360 = vmatmul.mubr.msk.f32.vlgmr.msra.gmra.mrb[0].mxu0 %vm56_vm1, %v39_v3  ;;  %387 = vmatprep.subr.bf16.mxu0 %v480_v17  ;;  %s325_s6 = sshll.u32 %s483_s1, 4  ;;  %s326_s6 = int_to_ptr.vmem [resolvable:$true] %s325_s6 }
  0x2b   :  { %380 = vmatprep.mubr.msk.f32.mxu0 %vm481_vm3, %v482_v18  ;;  %s447_s7 = scalar_lea.vmem %s326_s6, 16  ;;  %s451_s8 = scalar_lea.vmem %s326_s6, 32 }
  0x2c   :  { %52 = vperm.xlu0 %402, %v39_v3   ;;  %p448_p2 = scmp.ne.s32.totalorder %s326_s6, %s447_s7  ;;  %p452_p3 = scmp.lt.s32.totalorder %s326_s6, %s326_s6 }
  0x2d   :  { %p453_p4 = scmp.lt.s32.totalorder %s451_s8, %s447_s7 }
  0x2f   :  { %p454_p5 = por %p453_p4, %p452_p3 }
  0x31   :  { %p455_p6 = pnand %p454_p5, %p448_p2 }
  0xa7   :  { %v48_v5 = vpop.permute.xlu0 %47 }
  0xab   :  { %v53_v6 = vpop.permute.xlu0 %52 }
  0xfd   :  { %v361_v7 = vpop.f32.mrb[0].mxu0 }
  0xfe   :  { %v137_v8 = vadd.f32 %v361_v7, %v53_v6  ;;  %v131_v9 = vpop.f32.mrb[1].mxu0 }
  0xff   :  { %v132_v10 = vadd.f32 %v131_v9, %v48_v5 }
 0x100   :  { %v141_v11 = vmax.f32 %v137_v8, 0.0 }
 0x101   :  { %v140_v12 = vmax.f32 %v132_v10, 0.0 }
 0x103   :  { %v383_v13 = vpack.c.bf16 %v141_v11, %v140_v12 }
 0x105   :  { %384 = vmatprep.subr.bf16.mxu1 %v383_v13 }
 0x106   :  { %386 = vmatpush3.bf16.msra.mxu1 %v383_v13 }
 0x109   :  { %367 = vmatmul.mubr.msk.f32.vlgmr.msra.gmra.mrb[0].mxu1 %vm142_vm2, %v41_v14 }
 0x10a   :  { %369 = vmatprep.mubr.msk.f32.mxu1 %vm142_vm2, %v42_v15 }
 0x10d   :  { %370 = vmatmul.mubr.msk.f32.gmra.mrb[2].mxu1 %vm142_vm2, %v43_v16 }
 0x1dc   :  { %v368_v19 = vpop.f32.mrb[0].mxu1 }
 0x1dd   :  { %v241_v20 = vmax.f32 %v368_v19, 0.0  ;;  %v221_v21 = vpop.f32.mrb[1].mxu1 }
 0x1de   :  { %v240_v22 = vmax.f32 %v221_v21, 0.0 }
 0x1e0   :  { %v388_v23 = vpack.c.bf16 %v241_v20, %v240_v22  ;;  %v371_v24 = vpop.f32.mrb[2].mxu1 }
 0x1e1   :  { %v243_v25 = vmax.f32 %v371_v24, 0.0  ;;  %v231_v26 = vpop.f32.mrb[3].mxu1 }
 0x1e2   :  { %v242_v27 = vmax.f32 %v231_v26, 0.0  ;;  %389 = vmatpush3.bf16.msra.mxu0 %v388_v23 }
 0x1e3   :  { %390 = vmatprep.subr.bf16.mxu0 %v480_v17 }
 0x1e4   :  { %v391_v28 = vpack.c.bf16 %v243_v25, %v242_v27 }
 0x1e6   :  { %392 = vmatpush3.bf16.msra.mxu0 %v391_v28 }
 0x1e9   :  { %381 = vmatmul.mubr.msk.f32.vlgmr.msra.gmra.mrb[2].mxu0 %vm244_vm4, %v44_v29 }
 0x2bc   :  { %v314_v30 = vpop.f32.mrb[2].mxu0 }
 0x2bd   :  { %318 = vst [vmem:[#allocation7] sm:$0x1] %v314_v30  ;;  %v382_v31 = vpop.f32.mrb[3].mxu0 }
 0x2be   :  { %458 = shalt.err (!%p455_p6)
}
 0x2bf   :  { %s459_s11 = scalar_lea.hbm %s541_s2, 16 }
 0x2c0   :  { %p460_p7 = scmp.ne.s32.totalorder %s541_s2, %s459_s11  ;;  %p463_p8 = scmp.lt.u32.totalorder %s459_s11, %s541_s2 }
 0x2c2   :  { %p465_p9 = pnand %p463_p8, %p460_p7 }
 0x2c4   :  { %468 = shalt.err (!%p465_p9)
}
 0x2c5   :  { %328 = dma.vmem_to_hbm [thread:$0]  %s326_s6, 16, %s541_s2, [#allocation4]  }
 0x2c6   :  { %473 = dma.done.wait [#allocation4], 16  }
 0x2c7   :  { %474 = vsyncadd [#allocation4], 4294967280 }
 0x2c8   :  { %332 = vsyncpa [#allocation3], 1 }
 0x2c9   :  { %333 = vsyncpa [#allocation6], 1 }
 0x2ca   :  { %334 = vsyncpa [#allocation4], 1 }

</bundles_post_ra>
